<compile_context>
chip_gen: v6e
topology: v6e:2x2x1
jax: 0.10.0
libtpu: 0.0.40
codegen_flags: <defaults>
</compile_context>

<pallas_src>
import functools

import jax
import jax.numpy as jnp
import numpy as np
from jax.experimental import pallas as pl
from jax.experimental.pallas import tpu as pltpu


# ----------------------------- small helpers -----------------------------

def _layernorm(x, w, b, eps=1e-5):
    mu = jnp.mean(x, axis=-1, keepdims=True)
    xc = x - mu
    var = jnp.mean(xc * xc, axis=-1, keepdims=True)
    return xc * jax.lax.rsqrt(var + eps) * w + b


def _gelu(x, approximate):
    if approximate:
        # tanh approximation (EUP-friendly); slight deviation from torch's exact GELU.
        return 0.5 * x * (1.0 + jnp.tanh(0.7978845608028654 * (x + 0.044715 * x * x * x)))
    # PyTorch nn.GELU() default: exact erf-based GELU (kept in f32 for fidelity).
    return 0.5 * x * (1.0 + jax.lax.erf(x * 0.7071067811865476))


def _pick_tile(S, target, mult):
    """Largest divisor of S that is <= target and a multiple of `mult`, else S."""
    if S <= target:
        return S
    t = (target // mult) * mult
    while t >= mult:
        if S % t == 0:
            return t
        t -= mult
    return S


def _vmem_limit_bytes():
    """Generation-aware VMEM limit: ~7/8 of physical (56 MiB on v7x, 112 MiB on v5e/v6e)."""
    try:
        cap = int(pltpu.get_tpu_info().vmem_capacity_bytes)
    except Exception:
        cap = 64 * 1024 * 1024   # conservative fallback, safe on every generation
    return (cap * 7) // 8


def _const_spec(a, index_map):
    """Full-array spec for a never-changing weight block, single-buffered."""
    try:
        return pl.BlockSpec(a.shape, index_map, pipeline_mode=pl.Buffered(1))
    except (TypeError, AttributeError):
        # Older JAX without pipeline_mode: fall back to default double-buffering.
        return pl.BlockSpec(a.shape, index_map)


# ------------------------- kernel 1: LN1 + fused QKV -------------------------

def qkv_kernel(x_ref, ln1_w_ref, ln1_b_ref, wqkv_ref, bqkv_ref,
               q_ref, kt_ref, v_ref, *, num_heads, head_dim, compute_dtype):
    H, hd = num_heads, head_dim
    E = H * hd
    cdt = compute_dtype

    xn = _layernorm(x_ref[...], ln1_w_ref[0], ln1_b_ref[0])            # (st, E) f32
    qkv = jnp.dot(xn.astype(cdt), wqkv_ref[...],
                  preferred_element_type=jnp.float32) + bqkv_ref[0]     # (st, 3E) f32
    qkv_c = qkv.astype(cdt)                                             # one cast for Q/V slices

    # K is stored transposed (hd on sublanes, S on lanes): one (st,E) transpose,
    # then cheap sublane-aligned per-head row slices.
    k_all_t = qkv[:, E:2 * E].T                                         # (E, st) f32

    for h in range(H):
        lo = h * hd
        q_ref[h] = qkv_c[:, lo:lo + hd]                                 # (st, hd)
        v_ref[h] = qkv_c[:, 2 * E + lo:2 * E + lo + hd]                 # (st, hd)
        kt_ref[h] = k_all_t[lo:lo + hd, :].astype(cdt)                  # (hd, st)


# --------------- kernel 2: flash attention + out-proj + MLP ------------------

def attn_mlp_kernel(x_ref, q_ref, kt_ref, v_ref,
                    wo_ref, bo_ref, ln2_w_ref, ln2_b_ref,
                    w1_ref, b1_ref, w2_ref, b2_ref,
                    o_ref,
                    m_scr, l_scr, acc_scr,
                    *, num_heads, head_dim, q_tile, compute_dtype,
                    approx_recip, approx_gelu):
    H, hd, tq = num_heads, head_dim, q_tile
    cdt = compute_dtype
    ki = pl.program_id(2)

    @pl.when(ki == 0)
    def _init():
        m_scr[...] = jnp.full_like(m_scr, -jnp.inf)
        l_scr[...] = jnp.zeros_like(l_scr)
        acc_scr[...] = jnp.zeros_like(acc_scr)

    # ---- one K/V block of online-softmax attention ----
    q = q_ref[...]                                                      # (H, tq, hd) cdt
    kt = kt_ref[...]                                                    # (H, hd, tk) cdt
    v = v_ref[...]                                                      # (H, tk, hd) cdt

    s = jnp.einsum('hqd,hdk->hqk', q, kt,
                   preferred_element_type=jnp.float32)                  # (H, tq, tk) f32

    m_prev = m_scr[...]
    m_new = jnp.maximum(m_prev, jnp.max(s, axis=-1, keepdims=True))
    alpha = jnp.exp(m_prev - m_new)                                     # f32 (H, tq, 1)
    # exp in the compute dtype (bf16 on the fast path -> 2x EUP throughput, half-size p)
    p = jnp.exp((s - m_new).astype(cdt))                                # (H, tq, tk) cdt

    l_scr[...] = alpha * l_scr[...] + jnp.sum(p, axis=-1, keepdims=True,
                                              dtype=jnp.float32)
    acc_scr[...] = alpha * acc_scr[...] + jnp.einsum(
        'hqk,hkd->hqd', p, v, preferred_element_type=jnp.float32)       # (H, tq, hd) f32
    m_scr[...] = m_new

    # ---- finalize: out-proj, residual, LN2, MLP, residual ----
    @pl.when(ki == pl.num_programs(2) - 1)
    def _finalize():
        inv_l = pl.reciprocal(l_scr[...], approx=approx_recip)          # (H, tq, 1)
        ctx = acc_scr[...] * inv_l                                      # (H, tq, hd) f32

        # Head merge == torch's concat; the head-sum then happens inside a single
        # full-depth (tq,E)x(E,E) MXU contraction (no (H,tq,E) intermediate).
        ctx2 = jnp.concatenate([ctx[h] for h in range(H)], axis=-1)     # (tq, E) f32
        attn = jnp.dot(ctx2.astype(cdt), wo_ref[...],
                       preferred_element_type=jnp.float32) + bo_ref[0]  # (tq, E) f32

        x1 = x_ref[...] + attn                                          # residual 1

        xn2 = _layernorm(x1, ln2_w_ref[0], ln2_b_ref[0])
        hmid = jnp.dot(xn2.astype(cdt), w1_ref[...],
                       preferred_element_type=jnp.float32) + b1_ref[0]  # (tq, mlp) f32
        hmid = _gelu(hmid, approx_gelu).astype(cdt)                     # narrow before 2nd matmul
        mlp = jnp.dot(hmid, w2_ref[...],
                      preferred_element_type=jnp.float32) + b2_ref[0]

        o_ref[...] = (x1 + mlp).astype(o_ref.dtype)                     # residual 2


# ------------------------------ host wrapper -------------------------------

def transformer_encoder_layer(x, kp, num_heads, *, q_tile=None, kv_tile=None,
                              compute_dtype=jnp.bfloat16, approx_gelu=False):
    B, S, E = x.shape
    assert E % num_heads == 0
    hd = E // num_heads
    cdt = np.dtype(compute_dtype)
    approx_recip = cdt != np.dtype(np.float32)

    vmem_limit = _vmem_limit_bytes()
    small_vmem = vmem_limit < 100 * 1024 * 1024          # v7x-class (64 MiB physical)
    if q_tile is None:
        q_tile = _pick_tile(S, 256 if small_vmem else 512, 16)   # 16: bf16 sublane packing
    if kv_tile is None:
        kv_tile = _pick_tile(S, 512, 128)                # 128: transposed-K lane axis
    seq_tile = kv_tile                                   # kernel-1 writes K^T -> same constraint
    assert S % q_tile == 0 and S % kv_tile == 0

    n_st, n_qt, n_kv = S // seq_tile, S // q_tile, S // kv_tile
    cparams = dict(vmem_limit_bytes=vmem_limit)

    # -------- pass 1: LN1 + fused QKV projection, per-head layout --------
    qkv_weights = [kp["ln1_w"], kp["ln1_b"], kp["w_qkv"], kp["b_qkv"]]
    k1 = functools.partial(qkv_kernel, num_heads=num_heads, head_dim=hd,
                           compute_dtype=cdt)
    q, kt, v = pl.pallas_call(
        k1,
        out_shape=(jax.ShapeDtypeStruct((B, num_heads, S, hd), cdt),
                   jax.ShapeDtypeStruct((B, num_heads, hd, S), cdt),
                   jax.ShapeDtypeStruct((B, num_heads, S, hd), cdt)),
        grid=(B, n_st),
        in_specs=[pl.BlockSpec((None, seq_tile, E), lambda b, s: (b, s, 0))]
                 + [_const_spec(a, lambda b, s, _z=(0,) * a.ndim: _z)
                    for a in qkv_weights],
        out_specs=(
            pl.BlockSpec((None, num_heads, seq_tile, hd), lambda b, s: (b, 0, s, 0)),
            pl.BlockSpec((None, num_heads, hd, seq_tile), lambda b, s: (b, 0, 0, s)),
            pl.BlockSpec((None, num_heads, seq_tile, hd), lambda b, s: (b, 0, s, 0)),
        ),
        compiler_params=pltpu.CompilerParams(
            dimension_semantics=("parallel", "parallel"), **cparams),
    )(x, *qkv_weights)

    # -------- pass 2: flash attention + out-proj + residual + LN2 + MLP --------
    mha_weights = [kp["wo_t"], kp["bo"], kp["ln2_w"], kp["ln2_b"],
                   kp["w1_t"], kp["b1"], kp["w2_t"], kp["b2"]]
    k2 = functools.partial(attn_mlp_kernel, num_heads=num_heads, head_dim=hd,
                           q_tile=q_tile, compute_dtype=cdt,
                           approx_recip=approx_recip, approx_gelu=approx_gelu)
    return pl.pallas_call(
        k2,
        out_shape=jax.ShapeDtypeStruct((B, S, E), x.dtype),
        grid=(B, n_qt, n_kv),
        in_specs=[pl.BlockSpec((None, q_tile, E), lambda b, qi, ki: (b, qi, 0)),
                  pl.BlockSpec((None, num_heads, q_tile, hd),
                               lambda b, qi, ki: (b, 0, qi, 0)),
                  pl.BlockSpec((None, num_heads, hd, kv_tile),
                               lambda b, qi, ki: (b, 0, 0, ki)),
                  pl.BlockSpec((None, num_heads, kv_tile, hd),
                               lambda b, qi, ki: (b, 0, ki, 0))]
                 + [_const_spec(a, lambda b, qi, ki, _z=(0,) * a.ndim: _z)
                    for a in mha_weights],
        out_specs=pl.BlockSpec((None, q_tile, E), lambda b, qi, ki: (b, qi, 0)),
        scratch_shapes=[
            pltpu.VMEM((num_heads, q_tile, 1), jnp.float32),    # running max
            pltpu.VMEM((num_heads, q_tile, 1), jnp.float32),    # running sum
            pltpu.VMEM((num_heads, q_tile, hd), jnp.float32),   # output accumulator
        ],
        compiler_params=pltpu.CompilerParams(
            dimension_semantics=("parallel", "parallel", "arbitrary"), **cparams),
    )(x, q, kt, v, *mha_weights)


# --------------------------- parameter construction ------------------------

def init_raw_params(key, embed_dim, mlp_dim):
    """Deterministic synthetic parameters in PyTorch layout conventions."""
    ks = jax.random.split(key, 8)
    s = 0.05
    E = embed_dim
    return {
        "in_proj_w": jax.random.normal(ks[0], (3 * E, E), jnp.float32) * s,  # MHA in_proj_weight
        "in_proj_b": jax.random.normal(ks[1], (3 * E,), jnp.float32) * s,    # MHA in_proj_bias
        "wo": jax.random.normal(ks[2], (E, E), jnp.float32) * s,             # out_proj.weight (out,in)
        "bo": jax.random.normal(ks[3], (E,), jnp.float32) * s,
        "w1": jax.random.normal(ks[4], (mlp_dim, E), jnp.float32) * s,       # Linear1.weight (out,in)
        "b1": jax.random.normal(ks[5], (mlp_dim,), jnp.float32) * s,
        "w2": jax.random.normal(ks[6], (E, mlp_dim), jnp.float32) * s,       # Linear2.weight (out,in)
        "b2": jax.random.normal(ks[7], (E,), jnp.float32) * s,
        "ln1_w": jnp.ones((E,), jnp.float32), "ln1_b": jnp.zeros((E,), jnp.float32),
        "ln2_w": jnp.ones((E,), jnp.float32), "ln2_b": jnp.zeros((E,), jnp.float32),
    }


def prepare_kernel_params(raw, num_heads, compute_dtype):
    """Kernel-friendly layout: fused, pre-transposed QKV with the 1/sqrt(hd) scale folded
    into the Q weights/bias; matmul weights cast to the compute dtype; f32 LN/bias."""
    E = raw["in_proj_w"].shape[1]
    hd = E // num_heads
    scale = 1.0 / np.sqrt(hd)
    cdt = np.dtype(compute_dtype)
    f32 = jnp.float32

    wq, wk, wv = raw["in_proj_w"][:E], raw["in_proj_w"][E:2 * E], raw["in_proj_w"][2 * E:]
    bq, bk, bv = raw["in_proj_b"][:E], raw["in_proj_b"][E:2 * E], raw["in_proj_b"][2 * E:]

    w_qkv = jnp.concatenate([wq.T * scale, wk.T, wv.T], axis=1)       # (E, 3E)
    b_qkv = jnp.concatenate([bq * scale, bk, bv])[None, :]            # (1, 3E)

    return {
        "ln1_w": raw["ln1_w"][None, :].astype(f32), "ln1_b": raw["ln1_b"][None, :].astype(f32),
        "w_qkv": w_qkv.astype(cdt), "b_qkv": b_qkv.astype(f32),
        "wo_t": raw["wo"].T.astype(cdt), "bo": raw["bo"][None, :].astype(f32),
        "ln2_w": raw["ln2_w"][None, :].astype(f32), "ln2_b": raw["ln2_b"][None, :].astype(f32),
        "w1_t": raw["w1"].T.astype(cdt), "b1": raw["b1"][None, :].astype(f32),
        "w2_t": raw["w2"].T.astype(cdt), "b2": raw["b2"][None, :].astype(f32),
    }


# ------------------------------ pure-JAX reference -------------------------

def reference_forward(x, raw, num_heads):
    B, S, E = x.shape
    hd = E // num_heads
    scale = 1.0 / np.sqrt(hd)

    def ln(z, w, b):
        mu = jnp.mean(z, axis=-1, keepdims=True)
        var = jnp.mean((z - mu) ** 2, axis=-1, keepdims=True)
        return (z - mu) * jax.lax.rsqrt(var + 1e-5) * w + b

    wq, wk, wv = raw["in_proj_w"][:E], raw["in_proj_w"][E:2 * E], raw["in_proj_w"][2 * E:]
    bq, bk, bv = raw["in_proj_b"][:E], raw["in_proj_b"][E:2 * E], raw["in_proj_b"][2 * E:]

    xn = ln(x, raw["ln1_w"], raw["ln1_b"])
    q = (xn @ wq.T + bq) * scale
    k = xn @ wk.T + bk
    v = xn @ wv.T + bv
    q = q.reshape(B, S, num_heads, hd).transpose(0, 2, 1, 3)
    k = k.reshape(B, S, num_heads, hd).transpose(0, 2, 1, 3)
    v = v.reshape(B, S, num_heads, hd).transpose(0, 2, 1, 3)
    scores = jnp.einsum("bhqd,bhkd->bhqk", q, k)
    pa = jax.nn.softmax(scores, axis=-1)
    attn = jnp.einsum("bhqk,bhkd->bhqd", pa, v).transpose(0, 2, 1, 3).reshape(B, S, E)
    attn = attn @ raw["wo"].T + raw["bo"]
    x1 = x + attn
    xn2 = ln(x1, raw["ln2_w"], raw["ln2_b"])
    h = xn2 @ raw["w1"].T + raw["b1"]
    h = 0.5 * h * (1.0 + jax.lax.erf(h / np.sqrt(2.0)))
    return x1 + (h @ raw["w2"].T + raw["b2"])


# ----------------------------------- main -----------------------------------

if __name__ == "__main__":
    B, S, E = 2, 8, 32
    num_heads = 4
    mlp_dim = 64

    key = jax.random.PRNGKey(0)
    kx, kparams = jax.random.split(key)
    x = jax.random.normal(kx, (B, S, E), jnp.float32)
    raw = init_raw_params(kparams, E, mlp_dim)

    ref = jax.block_until_ready(reference_forward(x, raw, num_heads))

    # 1) f32 compute path — validates exact forward semantics.
    kp_f32 = prepare_kernel_params(raw, num_heads, jnp.float32)
    out_f32 = jax.block_until_ready(
        transformer_encoder_layer(x, kp_f32, num_heads, compute_dtype=jnp.float32))
    np.testing.assert_allclose(np.asarray(out_f32), np.asarray(ref), rtol=1e-3, atol=1e-3)

    # 2) bf16 MXU path (f32 accumulation / statistics) — the performance configuration.
    kp_bf16 = prepare_kernel_params(raw, num_heads, jnp.bfloat16)
    out_bf16 = jax.block_until_ready(
        transformer_encoder_layer(x, kp_bf16, num_heads, compute_dtype=jnp.bfloat16))
    np.testing.assert_allclose(np.asarray(out_bf16), np.asarray(ref), rtol=5e-2, atol=5e-2)

    print("KERNEL_OK")
</pallas_src>

<mosaic_0001>
module attributes {stable_mosaic.version = 11 : i64} {
  func.func @qkv_kernel(%arg0: i32, %arg1: i32, %arg2: memref<1x8x32xf32, #tpu.memory_space<vmem>>, %arg3: memref<1x32xf32, #tpu.memory_space<vmem>>, %arg4: memref<1x32xf32, #tpu.memory_space<vmem>>, %arg5: memref<32x96xf32, #tpu.memory_space<vmem>>, %arg6: memref<1x96xf32, #tpu.memory_space<vmem>>, %arg7: memref<1x4x8x8xf32, #tpu.memory_space<vmem>>, %arg8: memref<1x4x8x8xf32, #tpu.memory_space<vmem>>, %arg9: memref<1x4x8x8xf32, #tpu.memory_space<vmem>>) attributes {dimension_semantics = [#tpu.dimension_semantics<parallel>, #tpu.dimension_semantics<parallel>], iteration_bounds = array<i64: 2, 1>, scalar_prefetch = 0 : i64, scratch_operands = 0 : i64, tpu.core_type = #tpu.core_type<tc>, window_params = [{transform_indices = @transform_0, window_bounds = array<i64: 1, 8, 32>}, {pipeline_mode = #tpu.pipeline_mode<synchronous>, transform_indices = @transform_1, window_bounds = array<i64: 1, 32>}, {pipeline_mode = #tpu.pipeline_mode<synchronous>, transform_indices = @transform_2, window_bounds = array<i64: 1, 32>}, {pipeline_mode = #tpu.pipeline_mode<synchronous>, transform_indices = @transform_3, window_bounds = array<i64: 32, 96>}, {pipeline_mode = #tpu.pipeline_mode<synchronous>, transform_indices = @transform_4, window_bounds = array<i64: 1, 96>}, {transform_indices = @transform_5, window_bounds = array<i64: 1, 4, 8, 8>}, {transform_indices = @transform_6, window_bounds = array<i64: 1, 4, 8, 8>}, {transform_indices = @transform_7, window_bounds = array<i64: 1, 4, 8, 8>}]} {
    %c0 = arith.constant 0 : index
    %c0_0 = arith.constant 0 : index
    %c0_1 = arith.constant 0 : index
    %0 = vector.load %arg2[%c0, %c0_0, %c0_1] : memref<1x8x32xf32, #tpu.memory_space<vmem>>, vector<1x8x32xf32>
    %1 = vector.shape_cast %0 : vector<1x8x32xf32> to vector<8x32xf32>
    %c0_2 = arith.constant 0 : index
    %c0_3 = arith.constant 0 : index
    %2 = vector.load %arg3[%c0_2, %c0_3] : memref<1x32xf32, #tpu.memory_space<vmem>>, vector<1x32xf32>
    %3 = vector.shape_cast %2 : vector<1x32xf32> to vector<32xf32>
    %c0_4 = arith.constant 0 : index
    %c0_5 = arith.constant 0 : index
    %4 = vector.load %arg4[%c0_4, %c0_5] : memref<1x32xf32, #tpu.memory_space<vmem>>, vector<1x32xf32>
    %5 = vector.shape_cast %4 : vector<1x32xf32> to vector<32xf32>
    %cst = arith.constant dense<0.000000e+00> : vector<8xf32>
    %6 = vector.multi_reduction <add>, %1, %cst [1] : vector<8x32xf32> to vector<8xf32>
    %7 = vector.shape_cast %6 : vector<8xf32> to vector<8x1xf32>
    %cst_6 = arith.constant 3.200000e+01 : f32
    %8 = vector.broadcast %cst_6 : f32 to vector<8x1xf32>
    %9 = arith.divf %7, %8 : vector<8x1xf32>
    %10 = vector.broadcast %9 : vector<8x1xf32> to vector<8x32xf32>
    %11 = arith.subf %1, %10 : vector<8x32xf32>
    %12 = arith.mulf %11, %11 : vector<8x32xf32>
    %cst_7 = arith.constant dense<0.000000e+00> : vector<8xf32>
    %13 = vector.multi_reduction <add>, %12, %cst_7 [1] : vector<8x32xf32> to vector<8xf32>
    %14 = vector.shape_cast %13 : vector<8xf32> to vector<8x1xf32>
    %cst_8 = arith.constant 3.200000e+01 : f32
    %15 = vector.broadcast %cst_8 : f32 to vector<8x1xf32>
    %16 = arith.divf %14, %15 : vector<8x1xf32>
    %cst_9 = arith.constant 9.99999974E-6 : f32
    %17 = vector.broadcast %cst_9 : f32 to vector<8x1xf32>
    %18 = arith.addf %16, %17 : vector<8x1xf32>
    %19 = math.rsqrt %18 : vector<8x1xf32>
    %20 = vector.broadcast %19 : vector<8x1xf32> to vector<8x32xf32>
    %21 = arith.mulf %11, %20 : vector<8x32xf32>
    %22 = vector.shape_cast %3 : vector<32xf32> to vector<1x32xf32>
    %23 = vector.broadcast %22 : vector<1x32xf32> to vector<8x32xf32>
    %24 = arith.mulf %21, %23 : vector<8x32xf32>
    %25 = vector.shape_cast %5 : vector<32xf32> to vector<1x32xf32>
    %26 = vector.broadcast %25 : vector<1x32xf32> to vector<8x32xf32>
    %27 = arith.addf %24, %26 : vector<8x32xf32>
    %c0_10 = arith.constant 0 : index
    %c0_11 = arith.constant 0 : index
    %28 = vector.load %arg5[%c0_10, %c0_11] : memref<32x96xf32, #tpu.memory_space<vmem>>, vector<32x96xf32>
    %cst_12 = arith.constant dense<0.000000e+00> : vector<8x96xf32>
    %29 = tpu.matmul %27, %28, %cst_12 {dimension_numbers = #tpu.dot_dimension_numbers<[1], [0], [0], [1], [0, 0, 1, 1], [], []>} : vector<8x32xf32>, vector<32x96xf32>, vector<8x96xf32> -> vector<8x96xf32>
    %c0_13 = arith.constant 0 : index
    %c0_14 = arith.constant 0 : index
    %30 = vector.load %arg6[%c0_13, %c0_14] : memref<1x96xf32, #tpu.memory_space<vmem>>, vector<1x96xf32>
    %31 = vector.shape_cast %30 : vector<1x96xf32> to vector<96xf32>
    %32 = vector.shape_cast %31 : vector<96xf32> to vector<1x96xf32>
    %33 = vector.broadcast %32 : vector<1x96xf32> to vector<8x96xf32>
    %34 = arith.addf %29, %33 : vector<8x96xf32>
    %35 = vector.extract_strided_slice %34 {offsets = [0, 32], sizes = [8, 32], strides = [1, 1]} : vector<8x96xf32> to vector<8x32xf32>
    %36 = tpu.transpose %35, [1, 0] : vector<8x32xf32> -> vector<32x8xf32>
    %37 = vector.extract_strided_slice %34 {offsets = [0, 0], sizes = [8, 8], strides = [1, 1]} : vector<8x96xf32> to vector<8x8xf32>
    %c0_15 = arith.constant 0 : index
    %c0_16 = arith.constant 0 : index
    %c0_17 = arith.constant 0 : index
    %c0_18 = arith.constant 0 : index
    %38 = vector.load %arg7[%c0_15, %c0_16, %c0_17, %c0_18] : memref<1x4x8x8xf32, #tpu.memory_space<vmem>>, vector<1x1x8x8xf32>
    %39 = vector.shape_cast %38 : vector<1x1x8x8xf32> to vector<8x8xf32>
    %40 = vector.shape_cast %37 : vector<8x8xf32> to vector<1x1x8x8xf32>
    tpu.vector_store %arg7[%c0_15, %c0_16, %c0_17, %c0_18], %40 {strides = array<i32>} : memref<1x4x8x8xf32, #tpu.memory_space<vmem>>, vector<1x1x8x8xf32>,
    %41 = vector.extract_strided_slice %34 {offsets = [0, 64], sizes = [8, 8], strides = [1, 1]} : vector<8x96xf32> to vector<8x8xf32>
    %c0_19 = arith.constant 0 : index
    %c0_20 = arith.constant 0 : index
    %c0_21 = arith.constant 0 : index
    %c0_22 = arith.constant 0 : index
    %42 = vector.load %arg9[%c0_19, %c0_20, %c0_21, %c0_22] : memref<1x4x8x8xf32, #tpu.memory_space<vmem>>, vector<1x1x8x8xf32>
    %43 = vector.shape_cast %42 : vector<1x1x8x8xf32> to vector<8x8xf32>
    %44 = vector.shape_cast %41 : vector<8x8xf32> to vector<1x1x8x8xf32>
    tpu.vector_store %arg9[%c0_19, %c0_20, %c0_21, %c0_22], %44 {strides = array<i32>} : memref<1x4x8x8xf32, #tpu.memory_space<vmem>>, vector<1x1x8x8xf32>,
    %45 = vector.extract_strided_slice %36 {offsets = [0, 0], sizes = [8, 8], strides = [1, 1]} : vector<32x8xf32> to vector<8x8xf32>
    %c0_23 = arith.constant 0 : index
    %c0_24 = arith.constant 0 : index
    %c0_25 = arith.constant 0 : index
    %c0_26 = arith.constant 0 : index
    %46 = vector.load %arg8[%c0_23, %c0_24, %c0_25, %c0_26] : memref<1x4x8x8xf32, #tpu.memory_space<vmem>>, vector<1x1x8x8xf32>
    %47 = vector.shape_cast %46 : vector<1x1x8x8xf32> to vector<8x8xf32>
    %48 = vector.shape_cast %45 : vector<8x8xf32> to vector<1x1x8x8xf32>
    tpu.vector_store %arg8[%c0_23, %c0_24, %c0_25, %c0_26], %48 {strides = array<i32>} : memref<1x4x8x8xf32, #tpu.memory_space<vmem>>, vector<1x1x8x8xf32>,
    %49 = vector.extract_strided_slice %34 {offsets = [0, 8], sizes = [8, 8], strides = [1, 1]} : vector<8x96xf32> to vector<8x8xf32>
    %c0_27 = arith.constant 0 : index
    %c1 = arith.constant 1 : index
    %c0_28 = arith.constant 0 : index
    %c0_29 = arith.constant 0 : index
    %50 = vector.load %arg7[%c0_27, %c1, %c0_28, %c0_29] : memref<1x4x8x8xf32, #tpu.memory_space<vmem>>, vector<1x1x8x8xf32>
    %51 = vector.shape_cast %50 : vector<1x1x8x8xf32> to vector<8x8xf32>
    %52 = vector.shape_cast %49 : vector<8x8xf32> to vector<1x1x8x8xf32>
    tpu.vector_store %arg7[%c0_27, %c1, %c0_28, %c0_29], %52 {strides = array<i32>} : memref<1x4x8x8xf32, #tpu.memory_space<vmem>>, vector<1x1x8x8xf32>,
    %53 = vector.extract_strided_slice %34 {offsets = [0, 72], sizes = [8, 8], strides = [1, 1]} : vector<8x96xf32> to vector<8x8xf32>
    %c0_30 = arith.constant 0 : index
    %c1_31 = arith.constant 1 : index
    %c0_32 = arith.constant 0 : index
    %c0_33 = arith.constant 0 : index
    %54 = vector.load %arg9[%c0_30, %c1_31, %c0_32, %c0_33] : memref<1x4x8x8xf32, #tpu.memory_space<vmem>>, vector<1x1x8x8xf32>
    %55 = vector.shape_cast %54 : vector<1x1x8x8xf32> to vector<8x8xf32>
    %56 = vector.shape_cast %53 : vector<8x8xf32> to vector<1x1x8x8xf32>
    tpu.vector_store %arg9[%c0_30, %c1_31, %c0_32, %c0_33], %56 {strides = array<i32>} : memref<1x4x8x8xf32, #tpu.memory_space<vmem>>, vector<1x1x8x8xf32>,
    %57 = vector.extract_strided_slice %36 {offsets = [8, 0], sizes = [8, 8], strides = [1, 1]} : vector<32x8xf32> to vector<8x8xf32>
    %c0_34 = arith.constant 0 : index
    %c1_35 = arith.constant 1 : index
    %c0_36 = arith.constant 0 : index
    %c0_37 = arith.constant 0 : index
    %58 = vector.load %arg8[%c0_34, %c1_35, %c0_36, %c0_37] : memref<1x4x8x8xf32, #tpu.memory_space<vmem>>, vector<1x1x8x8xf32>
    %59 = vector.shape_cast %58 : vector<1x1x8x8xf32> to vector<8x8xf32>
    %60 = vector.shape_cast %57 : vector<8x8xf32> to vector<1x1x8x8xf32>
    tpu.vector_store %arg8[%c0_34, %c1_35, %c0_36, %c0_37], %60 {strides = array<i32>} : memref<1x4x8x8xf32, #tpu.memory_space<vmem>>, vector<1x1x8x8xf32>,
    %61 = vector.extract_strided_slice %34 {offsets = [0, 16], sizes = [8, 8], strides = [1, 1]} : vector<8x96xf32> to vector<8x8xf32>
    %c0_38 = arith.constant 0 : index
    %c2 = arith.constant 2 : index
    %c0_39 = arith.constant 0 : index
    %c0_40 = arith.constant 0 : index
    %62 = vector.load %arg7[%c0_38, %c2, %c0_39, %c0_40] : memref<1x4x8x8xf32, #tpu.memory_space<vmem>>, vector<1x1x8x8xf32>
    %63 = vector.shape_cast %62 : vector<1x1x8x8xf32> to vector<8x8xf32>
    %64 = vector.shape_cast %61 : vector<8x8xf32> to vector<1x1x8x8xf32>
    tpu.vector_store %arg7[%c0_38, %c2, %c0_39, %c0_40], %64 {strides = array<i32>} : memref<1x4x8x8xf32, #tpu.memory_space<vmem>>, vector<1x1x8x8xf32>,
    %65 = vector.extract_strided_slice %34 {offsets = [0, 80], sizes = [8, 8], strides = [1, 1]} : vector<8x96xf32> to vector<8x8xf32>
    %c0_41 = arith.constant 0 : index
    %c2_42 = arith.constant 2 : index
    %c0_43 = arith.constant 0 : index
    %c0_44 = arith.constant 0 : index
    %66 = vector.load %arg9[%c0_41, %c2_42, %c0_43, %c0_44] : memref<1x4x8x8xf32, #tpu.memory_space<vmem>>, vector<1x1x8x8xf32>
    %67 = vector.shape_cast %66 : vector<1x1x8x8xf32> to vector<8x8xf32>
    %68 = vector.shape_cast %65 : vector<8x8xf32> to vector<1x1x8x8xf32>
    tpu.vector_store %arg9[%c0_41, %c2_42, %c0_43, %c0_44], %68 {strides = array<i32>} : memref<1x4x8x8xf32, #tpu.memory_space<vmem>>, vector<1x1x8x8xf32>,
    %69 = vector.extract_strided_slice %36 {offsets = [16, 0], sizes = [8, 8], strides = [1, 1]} : vector<32x8xf32> to vector<8x8xf32>
    %c0_45 = arith.constant 0 : index
    %c2_46 = arith.constant 2 : index
    %c0_47 = arith.constant 0 : index
    %c0_48 = arith.constant 0 : index
    %70 = vector.load %arg8[%c0_45, %c2_46, %c0_47, %c0_48] : memref<1x4x8x8xf32, #tpu.memory_space<vmem>>, vector<1x1x8x8xf32>
    %71 = vector.shape_cast %70 : vector<1x1x8x8xf32> to vector<8x8xf32>
    %72 = vector.shape_cast %69 : vector<8x8xf32> to vector<1x1x8x8xf32>
    tpu.vector_store %arg8[%c0_45, %c2_46, %c0_47, %c0_48], %72 {strides = array<i32>} : memref<1x4x8x8xf32, #tpu.memory_space<vmem>>, vector<1x1x8x8xf32>,
    %73 = vector.extract_strided_slice %34 {offsets = [0, 24], sizes = [8, 8], strides = [1, 1]} : vector<8x96xf32> to vector<8x8xf32>
    %c0_49 = arith.constant 0 : index
    %c3 = arith.constant 3 : index
    %c0_50 = arith.constant 0 : index
    %c0_51 = arith.constant 0 : index
    %74 = vector.load %arg7[%c0_49, %c3, %c0_50, %c0_51] : memref<1x4x8x8xf32, #tpu.memory_space<vmem>>, vector<1x1x8x8xf32>
    %75 = vector.shape_cast %74 : vector<1x1x8x8xf32> to vector<8x8xf32>
    %76 = vector.shape_cast %73 : vector<8x8xf32> to vector<1x1x8x8xf32>
    tpu.vector_store %arg7[%c0_49, %c3, %c0_50, %c0_51], %76 {strides = array<i32>} : memref<1x4x8x8xf32, #tpu.memory_space<vmem>>, vector<1x1x8x8xf32>,
    %77 = vector.extract_strided_slice %34 {offsets = [0, 88], sizes = [8, 8], strides = [1, 1]} : vector<8x96xf32> to vector<8x8xf32>
    %c0_52 = arith.constant 0 : index
    %c3_53 = arith.constant 3 : index
    %c0_54 = arith.constant 0 : index
    %c0_55 = arith.constant 0 : index
    %78 = vector.load %arg9[%c0_52, %c3_53, %c0_54, %c0_55] : memref<1x4x8x8xf32, #tpu.memory_space<vmem>>, vector<1x1x8x8xf32>
    %79 = vector.shape_cast %78 : vector<1x1x8x8xf32> to vector<8x8xf32>
    %80 = vector.shape_cast %77 : vector<8x8xf32> to vector<1x1x8x8xf32>
    tpu.vector_store %arg9[%c0_52, %c3_53, %c0_54, %c0_55], %80 {strides = array<i32>} : memref<1x4x8x8xf32, #tpu.memory_space<vmem>>, vector<1x1x8x8xf32>,
    %81 = vector.extract_strided_slice %36 {offsets = [24, 0], sizes = [8, 8], strides = [1, 1]} : vector<32x8xf32> to vector<8x8xf32>
    %c0_56 = arith.constant 0 : index
    %c3_57 = arith.constant 3 : index
    %c0_58 = arith.constant 0 : index
    %c0_59 = arith.constant 0 : index
    %82 = vector.load %arg8[%c0_56, %c3_57, %c0_58, %c0_59] : memref<1x4x8x8xf32, #tpu.memory_space<vmem>>, vector<1x1x8x8xf32>
    %83 = vector.shape_cast %82 : vector<1x1x8x8xf32> to vector<8x8xf32>
    %84 = vector.shape_cast %81 : vector<8x8xf32> to vector<1x1x8x8xf32>
    tpu.vector_store %arg8[%c0_56, %c3_57, %c0_58, %c0_59], %84 {strides = array<i32>} : memref<1x4x8x8xf32, #tpu.memory_space<vmem>>, vector<1x1x8x8xf32>,
    return
  }
  func.func @transform_0(%arg0: i32, %arg1: i32) -> (i32, i32, i32) {
    %c0_i32 = arith.constant 0 : i32
    %c0_i32_0 = arith.constant 0 : i32
    return %arg0, %arg1, %c0_i32 : i32, i32, i32
  }
  func.func @transform_1(%arg0: i32, %arg1: i32) -> (i32, i32) {
    %c0_i32 = arith.constant 0 : i32
    %c0_i32_0 = arith.constant 0 : i32
    %c0_i32_1 = arith.constant 0 : i32
    return %c0_i32, %c0_i32_0 : i32, i32
  }
  func.func @transform_2(%arg0: i32, %arg1: i32) -> (i32, i32) {
    %c0_i32 = arith.constant 0 : i32
    %c0_i32_0 = arith.constant 0 : i32
    %c0_i32_1 = arith.constant 0 : i32
    return %c0_i32, %c0_i32_0 : i32, i32
  }
  func.func @transform_3(%arg0: i32, %arg1: i32) -> (i32, i32) {
    %c0_i32 = arith.constant 0 : i32
    %c0_i32_0 = arith.constant 0 : i32
    %c0_i32_1 = arith.constant 0 : i32
    return %c0_i32, %c0_i32_0 : i32, i32
  }
  func.func @transform_4(%arg0: i32, %arg1: i32) -> (i32, i32) {
    %c0_i32 = arith.constant 0 : i32
    %c0_i32_0 = arith.constant 0 : i32
    %c0_i32_1 = arith.constant 0 : i32
    return %c0_i32, %c0_i32_0 : i32, i32
  }
  func.func @transform_5(%arg0: i32, %arg1: i32) -> (i32, i32, i32, i32) {
    %c0_i32 = arith.constant 0 : i32
    %c0_i32_0 = arith.constant 0 : i32
    %c0_i32_1 = arith.constant 0 : i32
    return %arg0, %c0_i32, %arg1, %c0_i32_0 : i32, i32, i32, i32
  }
  func.func @transform_6(%arg0: i32, %arg1: i32) -> (i32, i32, i32, i32) {
    %c0_i32 = arith.constant 0 : i32
    %c0_i32_0 = arith.constant 0 : i32
    %c0_i32_1 = arith.constant 0 : i32
    return %arg0, %c0_i32, %c0_i32_0, %arg1 : i32, i32, i32, i32
  }
  func.func @transform_7(%arg0: i32, %arg1: i32) -> (i32, i32, i32, i32) {
    %c0_i32 = arith.constant 0 : i32
    %c0_i32_0 = arith.constant 0 : i32
    %c0_i32_1 = arith.constant 0 : i32
    return %arg0, %c0_i32, %arg1, %c0_i32_0 : i32, i32, i32, i32
  }
}

</mosaic_0001>

<bundles_post_ra>
// kernel: tpu_custom_call.1
= control target key start
LH: loop header
LB: loop body
LE: loop exit
PB: predicated region body
PF: predicated region fallthrough
CT: control target
= control target key end

     0   :  { %s1469_s0 = inlined_call_operand.hbm [shape: f32[2,8,32], index: 0, kind: input, shape index: {}]   ;;  %s1470_s1 = inlined_call_operand.vmem [shape: f32[1,32], index: 1, kind: input, shape index: {}]   ;;  %s1471_s2 = inlined_call_operand.vmem [shape: f32[1,32], index: 2, kind: input, shape index: {}]   ;;  %s1472_s3 = inlined_call_operand.hbm [shape: f32[32,96], index: 3, kind: input, shape index: {}]   ;;  %s1473_s4 = inlined_call_operand.vmem [shape: f32[1,96], index: 4, kind: input, shape index: {}]   ;;  %s1474_s5 = inlined_call_operand.hbm [shape: f32[2,4,8,8], index: 5, kind: output, shape index: {0}]   ;;  %s1475_s6 = inlined_call_operand.hbm [shape: f32[2,4,8,8], index: 6, kind: output, shape index: {1}]   ;;  %s1476_s7 = inlined_call_operand.hbm [shape: f32[2,4,8,8], index: 7, kind: output, shape index: {2}]  }
   0x1   :  { %1482 = sst [smem:[#allocation18_spill]] %s1472_s3 }
   0x2   :  { %13 = vsyncpa [#allocation3], 0 }
   0x3   :  { %15 = vsyncpa [#allocation3 + $0x1], 0 }
   0x4   :  { %16 = vsyncpa [#allocation6], 0 }
   0x5   :  { %17 = vsyncpa [#allocation4], 0 }
   0x6   :  { %19 = vsyncpa [#allocation4 + $0x1], 0 }
   0x7   :  { %20 = vsyncpa [#allocation9], 0 }
   0x8   :  { %22 = vsyncpa [#allocation9 + $0x1], 0  ;;  %s1171_s24 = smov 0   ;;  %s1173_s25 = smov 0  }
   0x9   :  { %s1175_s26 = smov 0   ;;  %s1177_s27 = smov 0  }
   0xa   :  { %s1179_s28 = smov 0   ;;  %s1181_s29 = smov 0  }
   0xb LB: > { %1483 = sst [smem:[#allocation15_spill]] %s1106_s28  ;;  %s1202_s30 = sadd.s32 4294967295, %s1110_s29   ;;  %s1110_s29 = sphi %s1181_s29, %s28_s29   ;;  %s1106_s28 = sphi %s1179_s28, %s1502_s28   ;;  %s1102_s27 = sphi %s1177_s27, %s1501_s27   ;;  %s1098_s26 = sphi %s1175_s26, %s1505_s26   ;;  %s1094_s25 = sphi %s1173_s25, %s1504_s25   ;;  %s1090_s24 = sphi %s1171_s24, %s1503_s24  }
   0xc   : > { %s1477_s8 = sadd.s32 4294967294, %s1110_s29   ;;  %p62_p0 = scmp.ne.s32.totalorder %s1094_s25, %s1090_s24 }
   0xd   : > { %p1481_p1 = scmp.eq.s32.totalorder %s1202_s30, 0  ;;  %p178_p3 = scmp.eq.s32.totalorder %s1477_s8, 1 }
   0xe   : > { %p763_p5 = scmp.ge.s32.totalorder %s1110_s29, 1  ;;  %p241_p7 = scmp.lt.s32.totalorder %s1110_s29, 3 }
   0xf   : > { %p1213_p4 = por %p1481_p1, %p62_p0  ;;  %p1218_p6 = por %p178_p3, %p62_p0 }
  0x10   : > { %p1223_p8 = pnand %p763_p5, %p241_p7  ;;  %s1112_s12 = smov [#allocation5]  }
  0x11   : > { %s1485_s10 = scalar_select %p1218_p6, 1, 0 }
  0x12   : > { %s259_s13 = sshll.u32 %s1112_s12, 4  ;;  %p829_p9 = pneg %p1223_p8  ;;  %s260_s13 = int_to_ptr.vmem [resolvable:$true] %s259_s13 }
  0x13   : > { %1486 = sst [smem:[#allocation16_spill]] %s1485_s10  ;;  %s40_s15 = sadd.s32 1, %s1106_s28 }
  0x14   : > { %p1232_p11 = pnand %p829_p9, %p1481_p1  ;;  %s927_s16 = scalar_lea.vmem %s260_s13, 512 }
  0x15   : > { %p928_p13 = scmp.ne.s32.totalorder %s260_s13, %s927_s16  ;;  %p935_p5 = scmp.lt.s32.totalorder %s260_s13, %s260_s13 }
  0x16   : > { %p918_p12 = pneg %p1232_p11  ;;  %p936_p7 = scmp.lt.s32.totalorder %s927_s16, %s927_s16 }
  0x18   : > { %p930_p0 = pnand %p928_p13, %p918_p12  ;;  %p937_p2 = por %p936_p7, %p935_p5 }
  0x1a   : > { %p931_p3 = pneg %p930_p0 }
  0x1c   : > { %p938_p6 = pnand %p937_p2, %p931_p3 }
  0x1e   : > { %941 = shalt.err (!%p938_p6)
}
  0x1f   : > { %s1113_s17 = smov 128   ;;  %s1114_s18 = smov 8  }
  0x20   : > { %s1489_s3 = sld [smem:[#allocation18_spill]]  ;;  %p42_p2 = scmp.ge.s32.totalorder %s40_s15, 2 }
  0x21   : > { %s49_s21 = sadd.s32 1, %s1098_s26  ;;  %p56_p6 = scmp.ne.s32.totalorder %s1098_s26, %s1094_s25 }
  0x22   : > { %p57_p9 = scmp.eq.s32.totalorder %s1110_s29, 0  ;;  %s1507_s15 = smov (%p42_p2, %s40_s15), 0 }
  0x23   : > { %1490 = sst [smem:[#allocation17_spill]] %s1507_s15  ;;  %p1492_p13 = scmp.eq.s32.totalorder %s1202_s30, 1 }
  0x24   : > { %p1250_p12 = por %p57_p9, %p56_p6  ;;  %s44_s12 = ssub.s32 %s1106_s28, %s1507_s15 }
  0x25   : > { %p1256_p0 = por %p1492_p13, %p56_p6  ;;  %p848_p3 = scmp.lt.s32.totalorder %s1110_s29, 2 }
  0x26   : > { %832 = dma.hbm_to_vmem [thread:$0]  (!%p1232_p11), %s1489_s3, 512, %s260_s13, [#allocation6], %s1113_s17, %s1113_s17, %s1114_s18  }
  0x27   : > { %p47_p11 = scmp.eq.s32.totalorder %s44_s12, 0  ;;  %s276_s13 = sand.u32 1, %s1098_s26  }
  0x28   : > { %s766_s14 = sshll.u32 %s276_s13, 3  ;;  %s767_s17 = sshll.u32 %s1106_s28, 7 }
  0x29   : > { %s1265_s16 = scalar_select %p47_p11, %s1098_s26, %s49_s21  }
  0x2a   : > { %s286_s20 = scalar_lea.hbm %s1469_s0, %s767_s17  ;;  %s280_s8 = scalar_lea.vmem [#allocation2], %s766_s14 }
  0x2b   : > { %s288_s3 = sshll.u32 %s280_s8, 4  ;;  %p1273_p5 = pnand %p848_p3, %p1250_p12  ;;  %s289_s3 = int_to_ptr.vmem [resolvable:$true] %s288_s3 }
  0x2c   : > { %s277_s15 = scalar_lea.sflag [#allocation3], %s276_s13  ;;  %s955_s12 = scalar_lea.vmem %s289_s3, 128 }
  0x2d   : > { %p944_p7 = pneg %p1273_p5  ;;  %p956_p2 = scmp.ne.s32.totalorder %s289_s3, %s955_s12 }
  0x2e   : > { %s1115_s21 = smov [#allocation2]  }
  0x2f   : > { %p958_p6 = pnand %p956_p2, %p944_p7  ;;  %s960_s28 = sshll.u32 %s1115_s21, 4  ;;  %s961_s28 = int_to_ptr.vmem [resolvable:$false] %s960_s28 }
  0x30   : > { %s962_s17 = scalar_lea.vmem %s961_s28, 256  ;;  %p963_p13 = scmp.lt.s32.totalorder %s289_s3, %s961_s28 }
  0x31   : > { %p959_p9 = pneg %p958_p6  ;;  %p964_p11 = scmp.lt.s32.totalorder %s962_s17, %s955_s12 }
  0x33   : > { %p965_p10 = por %p964_p11, %p963_p13 }
  0x35   : > { %p966_p1 = pnand %p965_p10, %p959_p9 }
  0x37   : > { %969 = shalt.err (!%p966_p1)
}
  0x38   : > { %836 = dma.hbm_to_vmem [thread:$0]  (!%p1273_p5), %s286_s20, 128, %s289_s3, %s277_s15  }
  0x39   : > { %297 = sbr.rel (%p1223_p8) target bundleno = 856 (0x358), region = 40  ;;  %s1284_s8 = sand.u32 (!%p1223_p8), 1, %s1094_s25  }
  0x3a   : > { %s769_s22 = sshll.u32 (!%p1223_p8), %s1284_s8, 3  ;;  %s300_s13 = scalar_lea.sflag (!%p1223_p8), [#allocation3], %s1284_s8 }
  0x3b   : > { %s303_s14 = scalar_lea.vmem (!%p1223_p8), [#allocation2], %s769_s22 }
  0x3e   : > { %1073 = dma.done.wait (%p1213_p4), %s300_s13, 128  }
  0x3f   : > { %1075 = vsyncadd (%p1213_p4), %s300_s13, 4294967168  ;;  %p1495_p1 = scmp.eq.s32.totalorder %s1202_s30, 0 }
  0x41   : > { %1077 = dma.done.wait (%p1495_p1), [#allocation6], 512   ;;  %p1496_p10 = pmov %p1495_p1 }
  0x42   : > { %vm351_vm0 = vcmask 261120   ;;  %v348_v0 = vld [vmem:[%s303_s14] sm:$0xff]  ;;  %v1116_v8 = vmov 0.0   ;;  %vm1117_vm1 = vmmov 0   ;;  %v381_v10 = vld [vmem:[#allocation5 + $0x8] sm:$0xff]  ;;  %v380_v11 = vld [vmem:[#allocation5] sm:$0xff] }
  0x43   : > { %1079 = vsyncadd (%p1496_p10), [#allocation6], 4294966784  ;;  %v352_v1 = vsel %vm351_vm0, %v348_v0, 0.0  ;;  %v383_v7 = vld [vmem:[#allocation5 + $0x18] sm:$0xff]  ;;  %806 = vmatprep.subr.mxu0 %v1116_v8  ;;  %v382_v9 = vld [vmem:[#allocation5 + $0x10] sm:$0xff]  ;;  %814 = vmatprep.mubr.msk.f32.mxu0 %vm1117_vm1, %v1116_v8  ;;  %s1306_s11 = sshll.u32 %s1284_s8, 5 }
  0x44   : > { %353 = vadd.xlane.f32.xlu0 %v352_v1  ;;  %807 = vmatpush3.msra.mxu0 %v383_v7  ;;  %v774_v16 = vld [vmem:[%s1470_s1] ss:$0 sm:$0xff]  ;;  %vm500_vm2 = vcmask 64512   ;;  %s1118_s19 = smov 120   ;;  %s1119_s20 = smov 96  }
  0x45   : > { %808 = vmatprep.subr.mxu0 %v1116_v8  ;;  %v775_v18 = vld [vmem:[%s1471_s2] ss:$0 sm:$0xff]  ;;  %s1312_s12 = scalar_lea.vmem [#allocation7], %s1306_s11  ;;  %s1120_s21 = smov 64  }
  0x46   : > { %809 = vmatpush3.msra.mxu0 %v382_v9  ;;  %v776_v21 = vld [vmem:[%s1473_s4] ss:$0 sm:$0xff]  ;;  %s1121_s17 = smov 56   ;;  %s1122_s22 = smov 112  }
  0x47   : > { %810 = vmatprep.subr.mxu0 %v1116_v8  ;;  %s1123_s13 = smov 48   ;;  %s1124_s14 = smov 104  }
  0x48   : > { %811 = vmatpush3.msra.mxu0 %v381_v10  ;;  %s1125_s3 = smov 40   ;;  %s1319_s28 = scalar_lea.vmem [#allocation10], %s1306_s11 }
  0x49   : > { %812 = vmatprep.subr.mxu0 %v1116_v8  ;;  %s568_s9 = sshll.u32 %s1312_s12, 4  ;;  %s1329_s10 = sshll.u32 %s1102_s27, 9  ;;  %s1331_s9 = int_to_ptr.vmem [resolvable:$true] %s568_s9 }
  0x4a   : > { %813 = vmatpush3.msra.mxu0 %v380_v11  ;;  %s1126_s27 = smov [#allocation7]  }
  0xcd   : > { %v354_v2 = vpop.xlane.xlu0 %353 }
  0xce   : > { %v356_v3 = vmul.f32 0.03125, %v354_v2 }
  0xd0   : > { %v357_v4 = vsub.f32 %v348_v0, %v356_v3 }
  0xd2   : > { %v358_v5 = vmul.f32 %v357_v4, %v357_v4 }
  0xd4   : > { %v359_v6 = vsel %vm351_vm0, %v358_v5, 0.0 }
  0xd5   : > { %360 = vadd.xlane.f32.xlu0 %v359_v6 }
 0x15e   : > { %v361_v12 = vpop.xlane.xlu0 %360 }
 0x15f   : > { %v362_v13 = vmul.f32 0.03125, %v361_v12 }
 0x161   : > { %v363_v14 = vadd.f32 1e-05, %v362_v13 }
 0x163   : > { %914 = vrsqrt.f32 %v363_v14 }
 0x170   : > { %v915_v15 = vpop.eup %914 }
 0x171   : > { %v365_v17 = vmul.f32 %v915_v15, %v357_v4 }
 0x173   : > { %v372_v19 = vmul.f32 %v774_v16, %v365_v17 }
 0x175   : > { %v379_v20 = vadd.f32 %v775_v18, %v372_v19 }
 0x177   : > { %815 = vmatmul.mubr.msk.f32.vlgmr.msra.gmra.mxu0 %vm351_vm0, %v379_v20 }
 0x237   : > { %v460_v22 = vpop.f32.mrf.mxu0 }
 0x238   : > { %v461_v23 = vadd.f32 %v776_v21, %v460_v22 }
 0x239   : > { %v816_v24 = vpop.f32.mrf.mxu0 }
 0x23a   : > { %507 = vrot.lane.b32.xlu0 %v461_v23, %s1118_s19  ;;  %465 = vrot.lane.b32.xlu1 %v461_v23, %s1119_s20  ;;  %501 = vst.msk [vmem:[%s1312_s12] sm:$0xff] %vm500_vm2, %v461_v23  ;;  %s1339_s19 = scalar_lea.hbm %s1474_s5, %s1329_s10  ;;  %s544_s20 = scalar_lea.sflag [#allocation4], %s1284_s8 }
 0x23e   : > { %502 = vrot.lane.b32.xlu1 %v461_v23, %s1120_s21  ;;  %s970_s21 = scalar_lea.vmem %s1331_s9, 512 }
 0x23f   : > { %p971_p4 = scmp.ne.s32.totalorder %s1331_s9, %s970_s21 }
 0x241   : > { %p972_p8 = pnand %p971_p4, %p1256_p0 }
 0x242   : > { %512 = vrot.lane.b32.xlu1 %v461_v23, %s1121_s17  ;;  %s974_s17 = sshll.u32 %s1126_s27, 4  ;;  %s975_s17 = int_to_ptr.vmem [resolvable:$false] %s974_s17 }
 0x243   : > { %p973_p12 = pneg %p972_p8  ;;  %p977_p3 = scmp.lt.s32.totalorder %s1331_s9, %s975_s17 }
 0x246   : > { %519 = vrot.lane.b32.xlu1 %v461_v23, %s1122_s22  ;;  %s976_s22 = scalar_lea.vmem %s975_s17, 1024 }
 0x247   : > { %p978_p5 = scmp.lt.s32.totalorder %s976_s22, %s970_s21 }
 0x249   : > { %p979_p7 = por %p978_p5, %p977_p3 }
 0x24a   : > { %524 = vrot.lane.b32.xlu1 %v461_v23, %s1123_s13 }
 0x24b   : > { %p980_p2 = pnand %p979_p7, %p973_p12 }
 0x24e   : > { %531 = vrot.lane.b32.xlu1 %v461_v23, %s1124_s14 }
 0x252   : > { %536 = vrot.lane.b32.xlu1 %v461_v23, %s1125_s3 }
 0x2ac   : > { %v508_v25 = vpop.permute.xlu0 %507  ;;  %v466_v26 = vpop.permute.xlu1 %465 }
 0x2ad   : > { %778 = vst.msk [vmem:[%s1312_s12 + $0x8] sm:$0xff] %vm500_vm2, %v508_v25  ;;  %468 = vxpose.xlu1.b32.start.end [1/1] (short) (narrow) %v466_v26, 32 }
 0x2b0   : > { %v503_v27 = vpop.permute.xlu1 %502 }
 0x2b1   : > { %505 = vst.msk [vmem:[%s1319_s28] sm:$0xff] %vm500_vm2, %v503_v27 }
 0x2b4   : > { %v513_v28 = vpop.permute.xlu1 %512 }
 0x2b5   : > { %779 = vst.msk [vmem:[%s1319_s28 + $0x8] sm:$0xff] %vm500_vm2, %v513_v28 }
 0x2b8   : > { %v520_v29 = vpop.permute.xlu1 %519 }
 0x2b9   : > { %781 = vst.msk [vmem:[%s1312_s12 + $0x10] sm:$0xff] %vm500_vm2, %v520_v29 }
 0x2bc   : > { %v525_v30 = vpop.permute.xlu1 %524 }
 0x2bd   : > { %782 = vst.msk [vmem:[%s1319_s28 + $0x10] sm:$0xff] %vm500_vm2, %v525_v30 }
 0x2c0   : > { %v532_v31 = vpop.permute.xlu1 %531 }
 0x2c1   : > { %784 = vst.msk [vmem:[%s1312_s12 + $0x18] sm:$0xff] %vm500_vm2, %v532_v31 }
 0x2c2   : > { %983 = shalt.err (!%p980_p2)
}
 0x2c3   : > { %s984_s12 = scalar_lea.hbm %s1339_s19, 512  ;;  %s988_s3 = scalar_lea.hbm %s1474_s5, 1024 }
 0x2c4   : > { %p985_p6 = scmp.ne.s32.totalorder %s1339_s19, %s984_s12  ;;  %p989_p11 = scmp.lt.s32.totalorder %s1339_s19, %s1474_s5 }
 0x2c5   : > { %p990_p1 = scmp.lt.s32.totalorder %s988_s3, %s984_s12 }
 0x2c6   : > { %p986_p9 = pnand %p985_p6, %p1256_p0 }
 0x2c7   : > { %p991_p10 = por %p990_p1, %p989_p11 }
 0x2c8   : > { %p987_p13 = pneg %p986_p9 }
 0x2ca   : > { %p992_p4 = pnand %p991_p10, %p987_p13 }
 0x2cc   : > { %995 = shalt.err (!%p992_p4)
}
 0x2cd   : > { %s1127_s21 = smov 128   ;;  %s1128_s27 = smov 8   ;;  %v537_v32 = vpop.permute.xlu1 %536 }
 0x2ce   : > { %823 = dma.vmem_to_hbm [thread:$0]  (%p1256_p0), %s1331_s9, 512, %s1339_s19, %s544_s20, %s1127_s21, %s1127_s21, %s1128_s27  }
 0x2cf   : > { %785 = vst.msk [vmem:[%s1319_s28 + $0x18] sm:$0xff] %vm500_vm2, %v537_v32  ;;  %s340_s17 = scalar_lea.vmem [#allocation8], %s1306_s11  ;;  %s548_s12 = sand.u32 1, %s1202_s30  }
 0x2d0   : > { %s585_s22 = sshll.u32 %s340_s17, 4  ;;  %s602_s13 = sshll.u32 %s1319_s28, 4  ;;  %s1377_s22 = int_to_ptr.vmem [resolvable:$true] %s585_s22  ;;  %s1385_s13 = int_to_ptr.vmem [resolvable:$true] %s602_s13 }
 0x2d1   : > { %s1383_s11 = scalar_lea.hbm %s1475_s6, %s1329_s10  ;;  %s1391_s30 = scalar_lea.hbm %s1476_s7, %s1329_s10 }
 0x2d2   : > { %s1394_s28 = scalar_lea.sflag [#allocation9], %s548_s12  ;;  %s996_s14 = scalar_lea.vmem %s1377_s22, 512 }
 0x2d3   : > { %p997_p8 = scmp.ne.s32.totalorder %s1377_s22, %s996_s14  ;;  %s1129_s3 = smov [#allocation8]  }
 0x2d4   : > { %s1000_s15 = sshll.u32 %s1129_s3, 4  ;;  %s1001_s15 = int_to_ptr.vmem [resolvable:$false] %s1000_s15 }
 0x2d5   : > { %p998_p12 = pnand %p997_p8, %p1256_p0  ;;  %s1002_s18 = scalar_lea.vmem %s1001_s15, 1024 }
 0x2d6   : > { %p1003_p5 = scmp.lt.s32.totalorder %s1377_s22, %s1001_s15  ;;  %p1004_p7 = scmp.lt.s32.totalorder %s1002_s18, %s996_s14 }
 0x2d7   : > { %p999_p3 = pneg %p998_p12 }
 0x2d8   : > { %p1005_p2 = por %p1004_p7, %p1003_p5 }
 0x2da   : > { %p1006_p6 = pnand %p1005_p2, %p999_p3 }
 0x329   : > { %v484_v33 = vpop.trf.xlu1 }
 0x32a   : > { %506 = vst.msk [vmem:[%s340_s17] sm:$0xff] %vm500_vm2, %v484_v33 }
 0x32d   : > { %v485_v34 = vpop.trf.xlu1 }
 0x32e   : > { %780 = vst.msk [vmem:[%s340_s17 + $0x8] sm:$0xff] %vm500_vm2, %v485_v34 }
 0x331   : > { %v486_v35 = vpop.trf.xlu1 }
 0x332   : > { %783 = vst.msk [vmem:[%s340_s17 + $0x10] sm:$0xff] %vm500_vm2, %v486_v35 }
 0x335   : > { %v487_v36 = vpop.trf.xlu1 }
 0x336   : > { %786 = vst.msk [vmem:[%s340_s17 + $0x18] sm:$0xff] %vm500_vm2, %v487_v36 }
 0x337   : > { %1009 = shalt.err (!%p1006_p6)
}
 0x338   : > { %s1010_s10 = scalar_lea.hbm %s1383_s11, 512  ;;  %s1014_s8 = scalar_lea.hbm %s1475_s6, 1024 }
 0x339   : > { %p1011_p9 = scmp.ne.s32.totalorder %s1383_s11, %s1010_s10  ;;  %p1015_p1 = scmp.lt.s32.totalorder %s1383_s11, %s1475_s6 }
 0x33a   : > { %p1016_p10 = scmp.lt.s32.totalorder %s1014_s8, %s1010_s10 }
 0x33b   : > { %p1012_p13 = pnand %p1011_p9, %p1256_p0 }
 0x33c   : > { %p1017_p4 = por %p1016_p10, %p1015_p1 }
 0x33d   : > { %p1013_p11 = pneg %p1012_p13 }
 0x33f   : > { %p1018_p8 = pnand %p1017_p4, %p1013_p11 }
 0x341   : > { %1021 = shalt.err (!%p1018_p8)
}
 0x342   : > { %824 = dma.vmem_to_hbm [thread:$0]  (%p1256_p0), %s1377_s22, 512, %s1383_s11, %s1394_s28, %s1127_s21, %s1127_s21, %s1128_s27  }
 0x343   : > { %s1022_s20 = scalar_lea.vmem %s1385_s13, 512  ;;  %s1130_s14 = smov [#allocation10]  }
 0x344   : > { %p1023_p12 = scmp.ne.s32.totalorder %s1385_s13, %s1022_s20  ;;  %s1026_s3 = sshll.u32 %s1130_s14, 4  ;;  %s1027_s3 = int_to_ptr.vmem [resolvable:$false] %s1026_s3 }
 0x345   : > { %s1028_s15 = scalar_lea.vmem %s1027_s3, 1024  ;;  %p1029_p7 = scmp.lt.s32.totalorder %s1385_s13, %s1027_s3 }
 0x346   : > { %p1024_p3 = pnand %p1023_p12, %p1256_p0  ;;  %p1030_p2 = scmp.lt.s32.totalorder %s1028_s15, %s1022_s20 }
 0x348   : > { %p1025_p5 = pneg %p1024_p3  ;;  %p1031_p6 = por %p1030_p2, %p1029_p7 }
 0x34a   : > { %p1032_p9 = pnand %p1031_p6, %p1025_p5 }
 0x34c   : > { %1035 = shalt.err (!%p1032_p9)
}
 0x34d   : > { %s1036_s18 = scalar_lea.hbm %s1391_s30, 512  ;;  %s1040_s10 = scalar_lea.hbm %s1476_s7, 1024 }
 0x34e   : > { %p1037_p13 = scmp.ne.s32.totalorder %s1391_s30, %s1036_s18  ;;  %p1041_p10 = scmp.lt.s32.totalorder %s1391_s30, %s1476_s7 }
 0x34f   : > { %p1042_p4 = scmp.lt.s32.totalorder %s1040_s10, %s1036_s18 }
 0x350   : > { %p1038_p11 = pnand %p1037_p13, %p1256_p0 }
 0x351   : > { %p1043_p8 = por %p1042_p4, %p1041_p10 }
 0x352   : > { %p1039_p1 = pneg %p1038_p11 }
 0x354   : > { %p1044_p12 = pnand %p1043_p8, %p1039_p1 }
 0x356   : > { %1047 = shalt.err (!%p1044_p12)
}
 0x357   : > { %825 = dma.vmem_to_hbm [thread:$0]  (%p1256_p0), %s1385_s13, 512, %s1391_s30, %s1394_s28, %s1127_s21, %s1127_s21, %s1128_s27  }
 0x358 PF: > { %s1497_s8 = sld [smem:[#allocation16_spill]]  ;;  %s617_s9 = sand.u32 1, %s1090_s24  }
 0x359   : > { %p1499_p5 = scmp.ge.s32.totalorder %s1110_s29, 2  ;;  %s618_s19 = scalar_lea.sflag [#allocation4], %s617_s9 }
 0x35e   : > { %p1498_p3 = scmp.ne.s32.totalorder %s1497_s8, 0 }
 0x360   : > { %p838_p7 = pnand %p1499_p5, %p1498_p3 }
 0x362   : > { %p839_p2 = pneg %p838_p7 }
 0x364   : > { %1081 = dma.done.wait (%p839_p2), %s618_s19, 512  }
 0x365   : > { %1083 = vsyncadd (%p839_p2), %s618_s19, 4294966784  ;;  %s1500_s23 = sadd.s32 4294967294, %s1110_s29  }
 0x366   : > { %s626_s20 = sand.u32 1, %s1500_s23  }
 0x367   : > { %s627_s14 = scalar_lea.sflag [#allocation9], %s626_s20 }
 0x368   : > { %1085 = dma.done.wait (%p839_p2), %s627_s14, 1024  }
 0x369   : > { %1087 = vsyncadd (%p839_p2), %s627_s14, 4294966272  ;;  %s28_s29 = sadd.s32 1, %s1110_s29   ;;  %s1501_s27 = sld [smem:[#allocation15_spill]] }
 0x36a   : > { %p25_p0 = scmp.ge.s32.totalorder %s28_s29, 4   ;;  %s1502_s28 = sld [smem:[#allocation17_spill]] }
 0x36b   : > { %s1503_s24 = smov %s1094_s25  ;;  %s1504_s25 = smov %s1098_s26 }
 0x36c   : > { %s1505_s26 = smov %s1265_s16  ;;  %27 = sbr.rel (!%p25_p0) target bundleno = 11 (0xb), region = 130 }
 0x371   :  { %641 = vsyncpa [#allocation3], 1 }
 0x372   :  { %643 = vsyncpa [#allocation3 + $0x1], 1 }
 0x373   :  { %644 = vsyncpa [#allocation6], 1 }
 0x374   :  { %645 = vsyncpa [#allocation4], 1 }
 0x375   :  { %647 = vsyncpa [#allocation4 + $0x1], 1 }
 0x376   :  { %648 = vsyncpa [#allocation9], 1 }
 0x377   :  { %650 = vsyncpa [#allocation9 + $0x1], 1 }

</bundles_post_ra>
